<compile_context>
chip_gen: v7x
topology: tpu7x:2x2x1
jax: 0.10.0
libtpu: 0.0.40
codegen_flags: <defaults>
</compile_context>

<pallas_src>
import jax
import jax.numpy as jnp
from jax.experimental import pallas as pl
from jax.experimental.pallas import tpu as pltpu


def critic_kernel(x_ref, w1_ref, b1_ref, w2_ref, b2_ref, w3_ref, b3_ref, o_ref):
    # x streams from HBM in its native dtype; cast MXU operands in-kernel only.
    x = x_ref[...].astype(w1_ref.dtype)

    # Layer 1: Linear + ReLU.  MXU matmul with f32 accumulation; bias/ReLU in f32.
    h1 = jnp.dot(x, w1_ref[...], preferred_element_type=jnp.float32) + b1_ref[...]
    h1 = jnp.maximum(h1, 0.0)

    # Layer 2: Linear + ReLU.
    h2 = jnp.dot(h1.astype(w2_ref.dtype), w2_ref[...],
                 preferred_element_type=jnp.float32) + b2_ref[...]
    h2 = jnp.maximum(h2, 0.0)

    # Output head (out_features == 1): VPU multiply + XLU lane reduction instead
    # of an MXU matmul with a single output column.  w3_ref is the head weight
    # as a [1, h2] row; b3 is an SMEM scalar.
    v = jnp.sum(h2 * w3_ref[...], axis=-1) + b3_ref[0]          # (tile,)

    # Lane-dense store: o_ref block is (1, 1, tile) -> full-vreg stores.
    o_ref[...] = v.reshape(o_ref.shape).astype(o_ref.dtype)


def _round_up(n, m):
    return ((n + m - 1) // m) * m


def _pick_tile(batch, tile_b):
    """Largest sublane-aligned tile <= tile_b covering the batch; for large
    batches cap at ~B/2 so the 'parallel' grid spans both v7x TensorCores."""
    tile = min(tile_b, _round_up(batch, 8))
    if batch >= 1024:
        tile = min(tile, _round_up((batch + 1) // 2, 8))
    return max(tile, 8)


def critic_forward(x, params, *, tile_b=4096, compute_dtype=jnp.float32):
    """x: [B, obs_dim]. params: dict with w1,b1,w2,b2,w3,b3 ([in,out] weights).

    compute_dtype: dtype of the MXU operands (jnp.float32 or jnp.bfloat16).
    The bf16 path casts x inside the kernel (no extra HBM pass); accumulation
    and all elementwise math stay float32.  bf16 is an accuracy/perf trade-off
    acceptable for a value head.
    """
    w1 = params["w1"].astype(compute_dtype)
    w2 = params["w2"].astype(compute_dtype)
    b1 = params["b1"].astype(jnp.float32)
    b2 = params["b2"].astype(jnp.float32)
    w3 = params["w3"].reshape(1, -1).astype(jnp.float32)   # [h2,1] -> [1,h2] row
    b3 = params["b3"].reshape(-1).astype(jnp.float32)      # [1,1]  -> [1] (SMEM)

    B, obs_dim = x.shape
    tile = _pick_tile(B, tile_b)
    num_tiles = -(-B // tile)            # ceil; last block may be partial (no pad)

    out = pl.pallas_call(
        critic_kernel,
        # Lane-dense output: (num_tiles, 1, tile); reshaped to (B, 1) below.
        out_shape=jax.ShapeDtypeStruct((num_tiles, 1, tile), jnp.float32),
        grid=(num_tiles,),
        in_specs=[
            pl.BlockSpec((tile, obs_dim), lambda i: (i, 0)),    # x: streamed per tile
            pl.BlockSpec(w1.shape, lambda i: (0, 0)),           # weights: VMEM-resident
            pl.BlockSpec(b1.shape, lambda i: (0, 0)),
            pl.BlockSpec(w2.shape, lambda i: (0, 0)),
            pl.BlockSpec(b2.shape, lambda i: (0, 0)),
            pl.BlockSpec(w3.shape, lambda i: (0, 0)),
            pl.BlockSpec(memory_space=pltpu.MemorySpace.SMEM),  # b3 scalar
        ],
        out_specs=pl.BlockSpec((1, 1, tile), lambda i: (i, 0, 0)),
        compiler_params=pltpu.CompilerParams(
            dimension_semantics=("parallel",)),
    )(x, w1, b1, w2, b2, w3, b3)

    # Flatten lane-dense tiles back to (B, 1); drops any ragged-tail junk rows.
    return out.reshape(num_tiles * tile)[:B].reshape(B, 1)


def init_critic_params(key, obs_dim, layers_size):
    """Deterministic synthetic init (shapes match nn.Linear in the module)."""
    h1, h2 = layers_size
    k1, k2, k3, k4, k5, k6 = jax.random.split(key, 6)

    # Store weights as [in, out] so the kernel does x @ W.
    def lin(kw, kb, fan_in, fan_out):
        bound = 1.0 / jnp.sqrt(jnp.float32(fan_in))
        w = jax.random.uniform(kw, (fan_in, fan_out), jnp.float32, -bound, bound)
        b = jax.random.uniform(kb, (1, fan_out), jnp.float32, -bound, bound)
        return w, b

    w1, b1 = lin(k1, k2, obs_dim, h1)
    w2, b2 = lin(k3, k4, h1, h2)
    w3, b3 = lin(k5, k6, h2, 1)
    return {"w1": w1, "b1": b1, "w2": w2, "b2": b2, "w3": w3, "b3": b3}


def critic_ref(x, p):
    """Pure-JAX reference for correctness check."""
    h1 = jnp.maximum(x @ p["w1"] + p["b1"], 0.0)
    h2 = jnp.maximum(h1 @ p["w2"] + p["b2"], 0.0)
    return h2 @ p["w3"] + p["b3"]


if __name__ == "__main__":
    obs_dim = 16
    layers_size = [32, 32]

    key = jax.random.PRNGKey(0)
    k_x, k_p, k_x2, k_x3 = jax.random.split(key, 4)
    params = init_critic_params(k_p, obs_dim, layers_size)

    # Small batch: single block.
    x_small = jax.random.normal(k_x, (8, obs_dim), dtype=jnp.float32)
    out_small = jax.block_until_ready(critic_forward(x_small, params))
    ref_small = critic_ref(x_small, params)
    assert out_small.shape == (8, 1), out_small.shape
    assert jnp.allclose(out_small, ref_small, atol=1e-5, rtol=1e-5), "f32 small-batch mismatch"

    # Ragged batch with a small forced tile: exercises multi-step "parallel" grid
    # and the unpadded partial last block.
    x_rag = jax.random.normal(k_x2, (300, obs_dim), dtype=jnp.float32)
    out_rag = jax.block_until_ready(critic_forward(x_rag, params, tile_b=128))
    ref_rag = critic_ref(x_rag, params)
    assert out_rag.shape == (300, 1), out_rag.shape
    assert jnp.allclose(out_rag, ref_rag, atol=5e-5, rtol=5e-5), "f32 ragged multi-tile mismatch"

    # Larger batch with default tile: the half-cap keeps >= 2 grid steps (megacore).
    x_big = jax.random.normal(k_x3, (2048, obs_dim), dtype=jnp.float32)
    out_big = jax.block_until_ready(critic_forward(x_big, params))
    ref_big = critic_ref(x_big, params)
    assert out_big.shape == (2048, 1), out_big.shape
    assert jnp.allclose(out_big, ref_big, atol=5e-5, rtol=5e-5), "f32 large-batch mismatch"

    # bf16 MXU-operand path (weights bf16, x cast in-kernel; f32 accumulate/elementwise).
    out_bf16 = jax.block_until_ready(
        critic_forward(x_big, params, compute_dtype=jnp.bfloat16))
    assert out_bf16.shape == (2048, 1), out_bf16.shape
    assert jnp.allclose(out_bf16, ref_big, atol=5e-2, rtol=5e-2), "bf16 path mismatch"

    print("KERNEL_OK")
</pallas_src>

<mosaic_0001>
module attributes {stable_mosaic.version = 11 : i64} {
  func.func @critic_kernel(%arg0: i32, %arg1: memref<8x16xf32, #tpu.memory_space<vmem>>, %arg2: memref<16x32xf32, #tpu.memory_space<vmem>>, %arg3: memref<1x32xf32, #tpu.memory_space<vmem>>, %arg4: memref<32x32xf32, #tpu.memory_space<vmem>>, %arg5: memref<1x32xf32, #tpu.memory_space<vmem>>, %arg6: memref<1x32xf32, #tpu.memory_space<vmem>>, %arg7: memref<1xf32, #tpu.memory_space<smem>>, %arg8: memref<1x1x8xf32, #tpu.memory_space<vmem>>) attributes {dimension_semantics = [#tpu.dimension_semantics<parallel>], iteration_bounds = array<i64: 1>, scalar_prefetch = 0 : i64, scratch_operands = 0 : i64, tpu.core_type = #tpu.core_type<tc>, window_params = [{transform_indices = @transform_0, window_bounds = array<i64: 8, 16>}, {pipeline_mode = #tpu.pipeline_mode<synchronous>, transform_indices = @transform_1, window_bounds = array<i64: 16, 32>}, {pipeline_mode = #tpu.pipeline_mode<synchronous>, transform_indices = @transform_2, window_bounds = array<i64: 1, 32>}, {pipeline_mode = #tpu.pipeline_mode<synchronous>, transform_indices = @transform_3, window_bounds = array<i64: 32, 32>}, {pipeline_mode = #tpu.pipeline_mode<synchronous>, transform_indices = @transform_4, window_bounds = array<i64: 1, 32>}, {pipeline_mode = #tpu.pipeline_mode<synchronous>, transform_indices = @transform_5, window_bounds = array<i64: 1, 32>}, {transform_indices = @transform_6, window_bounds = array<i64: 1>}, {transform_indices = @transform_7, window_bounds = array<i64: 1, 1, 8>}]} {
    %c0 = arith.constant 0 : index
    %c0_0 = arith.constant 0 : index
    %0 = vector.load %arg1[%c0, %c0_0] : memref<8x16xf32, #tpu.memory_space<vmem>>, vector<8x16xf32>
    %c0_1 = arith.constant 0 : index
    %c0_2 = arith.constant 0 : index
    %1 = vector.load %arg2[%c0_1, %c0_2] : memref<16x32xf32, #tpu.memory_space<vmem>>, vector<16x32xf32>
    %cst = arith.constant dense<0.000000e+00> : vector<8x32xf32>
    %2 = tpu.matmul %0, %1, %cst {dimension_numbers = #tpu.dot_dimension_numbers<[1], [0], [0], [1], [0, 0, 1, 1], [], []>} : vector<8x16xf32>, vector<16x32xf32>, vector<8x32xf32> -> vector<8x32xf32>
    %c0_3 = arith.constant 0 : index
    %c0_4 = arith.constant 0 : index
    %3 = vector.load %arg3[%c0_3, %c0_4] : memref<1x32xf32, #tpu.memory_space<vmem>>, vector<1x32xf32>
    %4 = vector.broadcast %3 : vector<1x32xf32> to vector<8x32xf32>
    %5 = arith.addf %2, %4 : vector<8x32xf32>
    %cst_5 = arith.constant 0.000000e+00 : f32
    %6 = vector.broadcast %cst_5 : f32 to vector<8x32xf32>
    %7 = arith.maximumf %5, %6 : vector<8x32xf32>
    %c0_6 = arith.constant 0 : index
    %c0_7 = arith.constant 0 : index
    %8 = vector.load %arg4[%c0_6, %c0_7] : memref<32x32xf32, #tpu.memory_space<vmem>>, vector<32x32xf32>
    %cst_8 = arith.constant dense<0.000000e+00> : vector<8x32xf32>
    %9 = tpu.matmul %7, %8, %cst_8 {dimension_numbers = #tpu.dot_dimension_numbers<[1], [0], [0], [1], [0, 0, 1, 1], [], []>} : vector<8x32xf32>, vector<32x32xf32>, vector<8x32xf32> -> vector<8x32xf32>
    %c0_9 = arith.constant 0 : index
    %c0_10 = arith.constant 0 : index
    %10 = vector.load %arg5[%c0_9, %c0_10] : memref<1x32xf32, #tpu.memory_space<vmem>>, vector<1x32xf32>
    %11 = vector.broadcast %10 : vector<1x32xf32> to vector<8x32xf32>
    %12 = arith.addf %9, %11 : vector<8x32xf32>
    %cst_11 = arith.constant 0.000000e+00 : f32
    %13 = vector.broadcast %cst_11 : f32 to vector<8x32xf32>
    %14 = arith.maximumf %12, %13 : vector<8x32xf32>
    %c0_12 = arith.constant 0 : index
    %c0_13 = arith.constant 0 : index
    %15 = vector.load %arg6[%c0_12, %c0_13] : memref<1x32xf32, #tpu.memory_space<vmem>>, vector<1x32xf32>
    %16 = vector.broadcast %15 : vector<1x32xf32> to vector<8x32xf32>
    %17 = arith.mulf %14, %16 : vector<8x32xf32>
    %cst_14 = arith.constant dense<0.000000e+00> : vector<8xf32>
    %18 = vector.multi_reduction <add>, %17, %cst_14 [1] : vector<8x32xf32> to vector<8xf32>
    %c0_15 = arith.constant 0 : index
    %19 = memref.load %arg7[%c0_15] : memref<1xf32, #tpu.memory_space<smem>>
    %20 = vector.broadcast %19 : f32 to vector<8xf32>
    %21 = arith.addf %18, %20 : vector<8xf32>
    %22 = vector.shape_cast %21 : vector<8xf32> to vector<1x1x8xf32>
    %c0_16 = arith.constant 0 : index
    %c0_17 = arith.constant 0 : index
    %c0_18 = arith.constant 0 : index
    %23 = vector.load %arg8[%c0_16, %c0_17, %c0_18] : memref<1x1x8xf32, #tpu.memory_space<vmem>>, vector<1x1x8xf32>
    tpu.vector_store %arg8[%c0_16, %c0_17, %c0_18], %22 {strides = array<i32>} : memref<1x1x8xf32, #tpu.memory_space<vmem>>, vector<1x1x8xf32>,
    return
  }
  func.func @transform_0(%arg0: i32) -> (i32, i32) {
    %c0_i32 = arith.constant 0 : i32
    %c0_i32_0 = arith.constant 0 : i32
    return %arg0, %c0_i32 : i32, i32
  }
  func.func @transform_1(%arg0: i32) -> (i32, i32) {
    %c0_i32 = arith.constant 0 : i32
    %c0_i32_0 = arith.constant 0 : i32
    %c0_i32_1 = arith.constant 0 : i32
    return %c0_i32, %c0_i32_0 : i32, i32
  }
  func.func @transform_2(%arg0: i32) -> (i32, i32) {
    %c0_i32 = arith.constant 0 : i32
    %c0_i32_0 = arith.constant 0 : i32
    %c0_i32_1 = arith.constant 0 : i32
    return %c0_i32, %c0_i32_0 : i32, i32
  }
  func.func @transform_3(%arg0: i32) -> (i32, i32) {
    %c0_i32 = arith.constant 0 : i32
    %c0_i32_0 = arith.constant 0 : i32
    %c0_i32_1 = arith.constant 0 : i32
    return %c0_i32, %c0_i32_0 : i32, i32
  }
  func.func @transform_4(%arg0: i32) -> (i32, i32) {
    %c0_i32 = arith.constant 0 : i32
    %c0_i32_0 = arith.constant 0 : i32
    %c0_i32_1 = arith.constant 0 : i32
    return %c0_i32, %c0_i32_0 : i32, i32
  }
  func.func @transform_5(%arg0: i32) -> (i32, i32) {
    %c0_i32 = arith.constant 0 : i32
    %c0_i32_0 = arith.constant 0 : i32
    %c0_i32_1 = arith.constant 0 : i32
    return %c0_i32, %c0_i32_0 : i32, i32
  }
  func.func @transform_6(%arg0: i32) -> i32 {
    %c0_i32 = arith.constant 0 : i32
    %c0_i32_0 = arith.constant 0 : i32
    return %c0_i32 : i32
  }
  func.func @transform_7(%arg0: i32) -> (i32, i32, i32) {
    %c0_i32 = arith.constant 0 : i32
    %c0_i32_0 = arith.constant 0 : i32
    %c0_i32_1 = arith.constant 0 : i32
    return %arg0, %c0_i32, %c0_i32_0 : i32, i32, i32
  }
}

</mosaic_0001>

<bundles_post_ra>
// kernel: tpu_custom_call.1
= control target key start
LH: loop header
LB: loop body
LE: loop exit
PB: predicated region body
PF: predicated region fallthrough
CT: control target
= control target key end

     0   :  { %13 = vsyncpa [#allocation4], 0  ;;  %s536_s0 = inlined_call_operand.hbm [shape: f32[8,16], index: 0, kind: input, shape index: {}]   ;;  %s537_s1 = inlined_call_operand.hbm [shape: f32[16,32], index: 1, kind: input, shape index: {}]   ;;  %s538_s2 = inlined_call_operand.vmem [shape: f32[1,32], index: 2, kind: input, shape index: {}]   ;;  %s539_s3 = inlined_call_operand.hbm [shape: f32[32,32], index: 3, kind: input, shape index: {}]   ;;  %s540_s4 = inlined_call_operand.vmem [shape: f32[1,32], index: 4, kind: input, shape index: {}]   ;;  %s541_s5 = inlined_call_operand.vmem [shape: f32[1,32], index: 5, kind: input, shape index: {}]   ;;  %s542_s6 = inlined_call_operand.<no memory space> [shape: f32[1], index: 6, kind: input, shape index: {}]   ;;  %s543_s7 = inlined_call_operand.hbm [shape: f32[1,1,8], index: 7, kind: output, shape index: {}]  }
   0x1   :  { %14 = vsyncpa [#allocation7], 0 }
   0x2   :  { %15 = vsyncpa [#allocation5], 0  ;;  %s421_s24 = smov [#allocation6]   ;;  %s327_s28 = scalar_lea.hbm %s537_s1, 256 }
   0x3   :  { %s31_s25 = sshll.u32 %s421_s24, 4  ;;  %p328_p0 = scmp.ne.s32.totalorder %s537_s1, %s327_s28  ;;  %s32_s25 = int_to_ptr.vmem [resolvable:$true] %s31_s25 }
   0x4   :  { %p331_p1 = scmp.lt.u32.totalorder %s327_s28, %s537_s1 }
   0x6   :  { %p333_p2 = pnand %p331_p1, %p328_p0 }
   0x8   :  { %336 = shalt.err (!%p333_p2)
}
   0x9   :  { %s337_s10 = scalar_lea.vmem %s32_s25, 256  ;;  %p342_p4 = scmp.lt.s32.totalorder %s32_s25, %s32_s25 }
   0xa   :  { %p338_p3 = scmp.ne.s32.totalorder %s32_s25, %s337_s10  ;;  %p343_p5 = scmp.lt.s32.totalorder %s337_s10, %s337_s10 }
   0xc   :  { %p344_p6 = por %p343_p5, %p342_p4 }
   0xe   :  { %p345_p7 = pnand %p344_p6, %p338_p3 }
  0x10   :  { %348 = shalt.err (!%p345_p7)
}
  0x11   :  { %s422_s11 = smov 128   ;;  %s423_s12 = smov 8  }
  0x12   :  { %37 = dma.hbm_to_vmem [thread:$0]  %s537_s1, 256, %s32_s25, [#allocation7], %s422_s11, %s422_s11, %s423_s12  }
  0x13   :  { %s424_s15 = smov [#allocation3]   ;;  %s425_s17 = smov [#allocation8]  }
  0x14   :  { %s22_s16 = sshll.u32 %s424_s15, 4  ;;  %s45_s18 = sshll.u32 %s425_s17, 4  ;;  %s23_s16 = int_to_ptr.vmem [resolvable:$true] %s22_s16  ;;  %s46_s18 = int_to_ptr.vmem [resolvable:$true] %s45_s18 }
  0x15   :  { %s349_s21 = scalar_lea.hbm %s536_s0, 128 }
  0x16   :  { %p350_p8 = scmp.ne.s32.totalorder %s536_s0, %s349_s21  ;;  %p353_p9 = scmp.lt.u32.totalorder %s349_s21, %s536_s0 }
  0x18   :  { %p355_p10 = pnand %p353_p9, %p350_p8 }
  0x1a   :  { %358 = shalt.err (!%p355_p10)
}
  0x1b   :  { %s359_s1 = scalar_lea.vmem %s23_s16, 128  ;;  %p364_p12 = scmp.lt.s32.totalorder %s23_s16, %s23_s16 }
  0x1c   :  { %p360_p11 = scmp.ne.s32.totalorder %s23_s16, %s359_s1  ;;  %p365_p13 = scmp.lt.s32.totalorder %s359_s1, %s359_s1 }
  0x1e   :  { %p366_p0 = por %p365_p13, %p364_p12 }
  0x20   :  { %p367_p1 = pnand %p366_p0, %p360_p11 }
  0x22   :  { %370 = shalt.err (!%p367_p1)
}
  0x23   :  { %25 = dma.hbm_to_vmem [thread:$0]  %s536_s0, 128, %s23_s16, [#allocation4]  }
  0x24   :  { %s371_s30 = scalar_lea.hbm %s539_s3, 512 }
  0x25   :  { %p372_p2 = scmp.ne.s32.totalorder %s539_s3, %s371_s30  ;;  %p375_p3 = scmp.lt.u32.totalorder %s371_s30, %s539_s3 }
  0x27   :  { %p377_p4 = pnand %p375_p3, %p372_p2 }
  0x29   :  { %380 = shalt.err (!%p377_p4)
}
  0x2a   :  { %s381_s14 = scalar_lea.vmem %s46_s18, 512  ;;  %p386_p6 = scmp.lt.s32.totalorder %s46_s18, %s46_s18 }
  0x2b   :  { %p382_p5 = scmp.ne.s32.totalorder %s46_s18, %s381_s14  ;;  %p387_p7 = scmp.lt.s32.totalorder %s381_s14, %s381_s14 }
  0x2d   :  { %p388_p8 = por %p387_p7, %p386_p6 }
  0x2f   :  { %p389_p9 = pnand %p388_p8, %p382_p5 }
  0x31   :  { %392 = shalt.err (!%p389_p9)
}
  0x32   :  { %51 = dma.hbm_to_vmem [thread:$0]  %s539_s3, 512, %s46_s18, [#allocation7], %s422_s11, %s422_s11, %s423_s12  }
  0x33   :  { %415 = dma.done.wait [#allocation4], 128  }
  0x34   :  { %416 = vsyncadd [#allocation4], 4294967168 }
  0x35   :  { %417 = dma.done.wait [#allocation7], 768  }
  0x36   :  { %418 = vsyncadd [#allocation7], 4294966528  ;;  %v426_v0 = vmov 0.0|0.0   ;;  %vm427_vm0 = vmmov 0   ;;  %v428_v1 = vmov 0.0   ;;  %v68_v2 = vld [vmem:[#allocation6] sm:$0xff]  ;;  %v253_v25 = vlaneseq }
  0x37   :  { %309 = vmatprep.subr.bf16.mxu0 %v426_v0  ;;  %295 = vmatprep.mubr.msk.f32.mxu0 %vm427_vm0, %v428_v1  ;;  %v69_v3 = vld [vmem:[#allocation6 + $0x8] sm:$0xff]  ;;  %v152_v5 = vld [vmem:[#allocation8] sm:$0xff]  ;;  %v153_v6 = vld [vmem:[#allocation8 + $0x8] sm:$0xff]  ;;  %vm77_vm1 = vcmask 130048   ;;  %vm163_vm2 = vcmask 261120   ;;  %v250_v28 = vstv %s542_s6  ;;  %vm260_vm3 = vcmask 57344  }
  0x38   :  { %312 = vmatprep.subr.bf16.mxu1 %v426_v0  ;;  %306 = vmatprep.mubr.msk.f32.mxu1 %vm427_vm0, %v428_v1  ;;  %v310_v4 = vpack.c.bf16 %v69_v3, %v68_v2  ;;  %v313_v7 = vpack.c.bf16 %v153_v6, %v152_v5  ;;  %v67_v8 = vld [vmem:[#allocation3] sm:$0xff]  ;;  %v154_v9 = vld [vmem:[#allocation8 + $0x10] sm:$0xff]  ;;  %v155_v10 = vld [vmem:[#allocation8 + $0x18] sm:$0xff]  ;;  %v254_v26 = vand.u32 127, %v253_v25  ;;  %v256_v27 = vshrl.u32 %v253_v25, 7 }
  0x39   :  { %v316_v11 = vpack.c.bf16 %v155_v10, %v154_v9  ;;  %v278_v12 = vld [vmem:[%s538_s2] ss:$0 sm:$0xff] }
  0x3a   :  { %311 = vmatpush3.bf16.msra.mxu0 %v310_v4  ;;  %314 = vmatpush3.bf16.msra.mxu1 %v313_v7  ;;  %v280_v17 = vld [vmem:[%s540_s4] ss:$0 sm:$0xff]  ;;  %v257_v29 = vsub.s32 %v254_v26, %v256_v27  ;;  %s429_s4 = smov [#allocation9]  }
  0x3b   :  { %315 = vmatprep.subr.bf16.mxu1 %v426_v0  ;;  %v282_v21 = vld [vmem:[%s541_s5] ss:$0 sm:$0xff]  ;;  %s268_s20 = sshll.u32 %s429_s4, 4  ;;  %s269_s20 = int_to_ptr.vmem [resolvable:$true] %s268_s20 }
  0x3c   :  { %s393_s5 = scalar_lea.vmem %s269_s20, 16  ;;  %s397_s21 = scalar_lea.vmem %s269_s20, 32 }
  0x3d   :  { %296 = vmatmul.mubr.msk.f32.vlgmr.msra.gmra.mrb[0].mxu0 %vm77_vm1, %v67_v8  ;;  %p394_p10 = scmp.ne.s32.totalorder %s269_s20, %s393_s5  ;;  %p398_p11 = scmp.lt.s32.totalorder %s269_s20, %s269_s20 }
  0x3e   :  { %317 = vmatpush3.bf16.msra.mxu1 %v316_v11  ;;  %p399_p12 = scmp.lt.s32.totalorder %s397_s21, %s393_s5 }
  0x40   :  { %p400_p13 = por %p399_p12, %p398_p11 }
  0x42   :  { %p401_p0 = pnand %p400_p13, %p394_p10 }
 0x110   :  { %v147_v13 = vpop.f32.mrb[0].mxu0 }
 0x111   :  { %v148_v14 = vadd.f32 %v278_v12, %v147_v13  ;;  %v297_v15 = vpop.f32.mrb[1].mxu0 }
 0x113   :  { %v151_v16 = vmax.f32 %v148_v14, 0.0 }
 0x115   :  { %307 = vmatmul.mubr.msk.f32.vlgmr.msra.gmra.mrb[0].mxu1 %vm163_vm2, %v151_v16 }
 0x1e8   :  { %v233_v18 = vpop.f32.mrb[0].mxu1 }
 0x1e9   :  { %v234_v19 = vadd.f32 %v280_v17, %v233_v18  ;;  %v308_v20 = vpop.f32.mrb[1].mxu1 }
 0x1eb   :  { %v237_v22 = vmax.f32 %v234_v19, 0.0 }
 0x1ed   :  { %v245_v23 = vmul.f32 %v282_v21, %v237_v22 }
 0x1ef   :  { %v246_v24 = vsel %vm163_vm2, %v245_v23, 0.0 }
 0x1f0   :  { %247 = vadd.xlane.f32.xlu0 %v246_v24 }
 0x27d   :  { %v248_v30 = vpop.xlane.xlu0 %247 }
 0x27e   :  { %v251_v31 = vadd.f32 %v250_v28, %v248_v30 }
 0x280   :  { %v258_v32 = vrot.slane %v251_v31, %v257_v29 }
 0x282   :  { %261 = vst.msk [vmem:[#allocation9] sm:$0x1] %vm260_vm3, %v258_v32 }
 0x283   :  { %404 = shalt.err (!%p401_p0)
}
 0x284   :  { %s405_s6 = scalar_lea.hbm %s543_s7, 16 }
 0x285   :  { %p406_p1 = scmp.ne.s32.totalorder %s543_s7, %s405_s6  ;;  %p409_p2 = scmp.lt.u32.totalorder %s405_s6, %s543_s7 }
 0x287   :  { %p411_p3 = pnand %p409_p2, %p406_p1 }
 0x289   :  { %414 = shalt.err (!%p411_p3)
}
 0x28a   :  { %271 = dma.vmem_to_hbm [thread:$0]  %s269_s20, 16, %s543_s7, [#allocation5]  }
 0x28b   :  { %419 = dma.done.wait [#allocation5], 16  }
 0x28c   :  { %420 = vsyncadd [#allocation5], 4294967280 }
 0x28d   :  { %275 = vsyncpa [#allocation4], 1 }
 0x28e   :  { %276 = vsyncpa [#allocation7], 1 }
 0x28f   :  { %277 = vsyncpa [#allocation5], 1 }

</bundles_post_ra>
